<compile_context>
chip_gen: v5e
topology: v5e:2x2
jax: 0.10.0
libtpu: 0.0.40
codegen_flags: <defaults>
</compile_context>

<pallas_src>
import jax
import jax.numpy as jnp
from jax.experimental import pallas as pl
from jax.experimental.pallas import tpu as pltpu


def _cast_kernel(x_ref, o_ref):
    # Elementwise dtype conversion on the whole VMEM tile (VPU work).
    o_ref[...] = x_ref[...].astype(o_ref.dtype)


# ~8 MiB per tile (sized on the wider of the two dtypes).  Worst-case
# double-buffered footprint is 2 * (8 MiB in + 8 MiB out) = 32 MiB, under the
# explicit 48 MiB scoped limit and under v7x's 64 MiB physical VMEM (v5e/v6e
# have 128 MiB, so this is safe everywhere).
_TILE_BYTE_BUDGET = 8 * 1024 * 1024
_VMEM_LIMIT_BYTES = 48 * 1024 * 1024

# Target at least this many grid steps when there is enough work, so the
# software pipeline overlaps read/compute/writeback and the parallel grid
# axis can be sharded across both v7x TensorCores.
_MIN_GRID_STEPS = 8


def _round_down_mult(v, m):
    return (v // m) * m


def _round_up_mult(v, m):
    return -(-v // m) * m


def _choose_tm(rows, w, max_itemsize):
    """Row-tile size: budget-limited, multiple of 32 sublanes, and capped so
    the grid has >= _MIN_GRID_STEPS steps whenever there are enough rows."""
    if rows <= 32:
        # Single block covering the whole (small) sublane extent; block dim
        # equals the full array dim so no (8, _) divisibility requirement.
        return rows
    tm = _TILE_BYTE_BUDGET // (w * max_itemsize)
    tm = max(32, _round_down_mult(tm, 32))
    # Never collapse to a 1-step grid: cap TM so we get ~_MIN_GRID_STEPS
    # steps (pipelining + megacore).
    tm_cap = max(32, _round_up_mult(-(-rows // _MIN_GRID_STEPS), 32))
    tm = min(tm, tm_cap, _round_down_mult(rows, 32))
    return max(tm, 32)


def _choose_flat_width(n):
    """Widest lane-dense column count (multiple of 128, <= 2048) dividing n."""
    for w in range(2048, 127, -128):
        if n % w == 0:
            return w
    return None


def _cast_2d(x2, target):
    """Run the cast kernel on a lane-dense 2D slab (rows, W), W % 128 == 0."""
    rows, w = x2.shape
    max_itemsize = max(x2.dtype.itemsize, jnp.dtype(target).itemsize)
    tm = _choose_tm(rows, w, max_itemsize)
    grid = -(-rows // tm)  # cdiv; Pallas masks the partial edge block

    n = rows * w
    cost = pl.CostEstimate(
        flops=0,
        transcendentals=0,
        bytes_accessed=n * x2.dtype.itemsize + n * jnp.dtype(target).itemsize,
    )

    return pl.pallas_call(
        _cast_kernel,
        out_shape=jax.ShapeDtypeStruct((rows, w), target),
        grid_spec=pltpu.PrefetchScalarGridSpec(
            num_scalar_prefetch=0,
            grid=(grid,),
            in_specs=[pl.BlockSpec((tm, w), lambda i: (i, 0))],
            out_specs=pl.BlockSpec((tm, w), lambda i: (i, 0)),
        ),
        compiler_params=pltpu.CompilerParams(
            dimension_semantics=("parallel",),
            vmem_limit_bytes=_VMEM_LIMIT_BYTES,
        ),
        cost_estimate=cost,
    )(x2)


def pallas_cast(x, dtype):
    """Cast `x` to `dtype` using a Pallas TPU kernel.

    Matches torch.Tensor.to(dtype): if dtype already matches, the input is
    returned unchanged (no copy / no kernel launch).
    """
    target = jnp.dtype(dtype)
    if x.dtype == target:
        return x

    orig_shape = x.shape
    n = int(x.size)
    if n == 0:
        # Degenerate empty tensor: no kernel needed.
        return x.astype(target)

    max_itemsize = max(x.dtype.itemsize, target.itemsize)

    # Path 1: trailing dim already lane-aligned -> collapse leading dims only
    # (free reshape, no relayout copy in the wrapper).
    if (x.ndim >= 2
            and orig_shape[-1] % 128 == 0
            and orig_shape[-1] * max_itemsize * 32 <= _TILE_BYTE_BUDGET):
        w = orig_shape[-1]
        out2 = _cast_2d(x.reshape(-1, w), target)
        return out2.reshape(orig_shape)

    x_flat = x.reshape(-1)

    # Path 2: some multiple of 128 (<= 2048) divides the element count ->
    # no padding needed at all.
    w = _choose_flat_width(n)
    if w is not None:
        out2 = _cast_2d(x_flat.reshape(n // w, w), target)
        return out2.reshape(orig_shape)

    # Path 3: no lane-aligned divisor.  Kernel on the largest 128-aligned
    # prefix; the <128-element tail is cast with plain astype and stitched
    # back.  Avoids full-tensor jnp.pad + output-slice copies.
    w = 128
    n_main = (n // w) * w
    if n_main == 0:
        # Tiny tensor (< 128 elements): a kernel launch is pure overhead.
        return x.astype(target)
    out_main = _cast_2d(x_flat[:n_main].reshape(n_main // w, w),
                        target).reshape(-1)
    out_tail = x_flat[n_main:].astype(target)
    return jnp.concatenate([out_main, out_tail]).reshape(orig_shape)


class Cast:
    """JAX/Pallas equivalent of the PyTorch Cast module."""

    def __init__(self, dtype):
        self._dtype = jnp.dtype(dtype)

    def __call__(self, x):
        return pallas_cast(x, self._dtype)


if __name__ == "__main__":
    key = jax.random.PRNGKey(0)

    # Small NCHW-ish input consistent with typical usage: (batch, C, H, W).
    x = jax.random.normal(key, (2, 4, 16, 16), dtype=jnp.float32)

    # Cast float32 -> bfloat16 (common onmt mixed-precision case).
    cast_mod = Cast(jnp.bfloat16)
    y = cast_mod(x)
    y = jax.block_until_ready(y)

    ref = x.astype(jnp.bfloat16)
    assert y.dtype == jnp.bfloat16
    assert y.shape == x.shape
    assert jnp.array_equal(y, ref)

    # "Already correct dtype" fast path: same array object is returned.
    z = cast_mod(y)
    z = jax.block_until_ready(z)
    assert z is y

    # Lane-aligned trailing dim exercises the leading-dim-collapse fast path.
    key1 = jax.random.PRNGKey(0)
    x_aligned = jax.random.normal(key1, (2, 8, 256), dtype=jnp.float32)
    y_aligned = jax.block_until_ready(Cast(jnp.bfloat16)(x_aligned))
    assert y_aligned.dtype == jnp.bfloat16
    assert y_aligned.shape == x_aligned.shape
    assert jnp.array_equal(y_aligned, x_aligned.astype(jnp.bfloat16))

    # Awkward size (not a multiple of 128) exercises the prefix+tail path.
    key2 = jax.random.PRNGKey(0)
    x_odd = jax.random.normal(key2, (3, 5, 7), dtype=jnp.float32)
    y_odd = jax.block_until_ready(Cast(jnp.bfloat16)(x_odd))
    assert y_odd.dtype == jnp.bfloat16
    assert y_odd.shape == x_odd.shape
    assert jnp.array_equal(y_odd, x_odd.astype(jnp.bfloat16))

    # Integer target dtype also works (torch .to accepts any dtype).
    y_int = jax.block_until_ready(Cast(jnp.int32)(x))
    assert y_int.dtype == jnp.int32
    assert jnp.array_equal(y_int, x.astype(jnp.int32))

    print("KERNEL_OK")
</pallas_src>

<mosaic_0001>
module attributes {stable_mosaic.version = 11 : i64} {
  func.func @_cast_kernel(%arg0: i32, %arg1: memref<1x2048xf32, #tpu.memory_space<vmem>>, %arg2: memref<1x2048xbf16, #tpu.memory_space<vmem>>) attributes {dimension_semantics = [#tpu.dimension_semantics<parallel>], iteration_bounds = array<i64: 1>, scalar_prefetch = 0 : i64, scratch_operands = 0 : i64, tpu.core_type = #tpu.core_type<tc>, window_params = [{transform_indices = @transform_0, window_bounds = array<i64: 1, 2048>}, {transform_indices = @transform_1, window_bounds = array<i64: 1, 2048>}]} {
    %c0 = arith.constant 0 : index
    %c0_0 = arith.constant 0 : index
    %0 = vector.load %arg1[%c0, %c0_0] : memref<1x2048xf32, #tpu.memory_space<vmem>>, vector<1x2048xf32>
    %1 = arith.truncf %0 : vector<1x2048xf32> to vector<1x2048xbf16>
    %c0_1 = arith.constant 0 : index
    %c0_2 = arith.constant 0 : index
    %2 = vector.load %arg2[%c0_1, %c0_2] : memref<1x2048xbf16, #tpu.memory_space<vmem>>, vector<1x2048xbf16>
    tpu.vector_store %arg2[%c0_1, %c0_2], %1 {strides = array<i32>} : memref<1x2048xbf16, #tpu.memory_space<vmem>>, vector<1x2048xbf16>,
    return
  }
  func.func @transform_0(%arg0: i32) -> (i32, i32) {
    %c0_i32 = arith.constant 0 : i32
    %c0_i32_0 = arith.constant 0 : i32
    return %arg0, %c0_i32 : i32, i32
  }
  func.func @transform_1(%arg0: i32) -> (i32, i32) {
    %c0_i32 = arith.constant 0 : i32
    %c0_i32_0 = arith.constant 0 : i32
    return %arg0, %c0_i32 : i32, i32
  }
}

</mosaic_0001>

<bundles_post_ra>
// kernel: tpu_custom_call.1
= control target key start
LH: loop header
LB: loop body
LE: loop exit
PB: predicated region body
PF: predicated region fallthrough
CT: control target
= control target key end

     0   :  { %6 = vsyncpa [#allocation3], 0  ;;  %s330_s0 = inlined_call_operand.hbm [shape: f32[1,2048], index: 0, kind: input, shape index: {}]   ;;  %s331_s1 = inlined_call_operand.hbm [shape: bf16[1,2048], index: 1, kind: output, shape index: {}]  }
   0x1   :  { %7 = vsyncpa [#allocation4], 0  ;;  %s13_s8 = sshll.u32 %s330_s0, 4  ;;  %s236_s9 = smov [#allocation2]   ;;  %s14_s8 = int_to_ptr.hbm [resolvable:$true] %s13_s8 }
   0x2   :  { %s15_s10 = sshll.u32 %s236_s9, 4  ;;  %s16_s10 = int_to_ptr.vmem [resolvable:$true] %s15_s10 }
   0x3   :  { %18 = dma.hbm_to_vmem [thread:$0]  %s14_s8, 256, %s16_s10, [#allocation3]  }
   0x4   :  { %232 = dma.done.wait [#allocation3], 256  }
   0x5   :  { %233 = vsyncadd [#allocation3], 4294967040  ;;  %vm332_vm0 = vcmask 1040384   ;;  %vm129_vm1 = vsmask.f32 256  ;;  %vm93_vm2 = vcmask 1042434  }
   0x6   :  { %vm252_vm3 = vmand %vm332_vm0, %vm129_vm1  ;;  %vm131_vm4 = vcmask 1041409   ;;  %vm132_vm5 = vsmask.f32 1280  ;;  %vm136_vm6 = vsmask.f32 2304  ;;  %vm139_vm9 = vcmask 1043459  }
   0x7   :  { %vm133_vm7 = vmand %vm131_vm4, %vm132_vm5  ;;  %vm140_vm10 = vsmask.f32 3328  ;;  %vm107_vm14 = vcmask 1045508   ;;  %vm109_vm0 = vcmask 1043456   ;;  %vm144_vm4 = vsmask.f32 4352 }
   0x8   :  { %vm134_vm8 = vmor %vm133_vm7, %vm252_vm3  ;;  %vm147_vm5 = vcmask 1045509   ;;  %vm148_vm3 = vsmask.f32 5376  ;;  %v23_v2 = vld [vmem:[#allocation2] sm:$0xff]  ;;  %vm152_vm11 = vsmask.f32 6400 }
   0x9   :  { %vm137_vm15 = vmand %vm93_vm2, %vm136_vm6  ;;  %vm155_vm12 = vcmask 1047559   ;;  %vm156_vm13 = vsmask.f32 7424  ;;  %v27_v4 = vperm.slane %v23_v2, 0  ;;  %v28_v5 = vperm.slane %v23_v2, 1  ;;  %v24_v8 = vld [vmem:[#allocation2 + $0x8] sm:$0xff] }
   0xa   :  { %vm259_vm1 = vmor %vm137_vm15, %vm134_vm8  ;;  %v29_v6 = vperm.slane %v23_v2, 2  ;;  %v30_v7 = vperm.slane %v23_v2, 3  ;;  %v31_v9 = vperm.slane %v23_v2, 4  ;;  %v32_v10 = vperm.slane %v23_v2, 5  ;;  %v159_v40 = vld [vmem:[#allocation5] sm:$0xff]  ;;  %s237_s0 = smov [#allocation5]  }
   0xb   :  { %vm263_vm7 = vmand %vm139_vm9, %vm140_vm10  ;;  %v33_v11 = vperm.slane %v23_v2, 6  ;;  %v34_v12 = vperm.slane %v23_v2, 7  ;;  %vm339_vm8 = vcmask 1044484   ;;  %v59_v13 = vpack.c.bf16 %v28_v5, %v27_v4  ;;  %s170_s11 = sshll.u32 %s237_s0, 4  ;;  %s172_s14 = sshll.u32 %s331_s1, 4  ;;  %v162_v61 = vld [vmem:[#allocation5 + $0x8] sm:$0xff]  ;;  %s171_s11 = int_to_ptr.vmem [resolvable:$true] %s170_s11  ;;  %s173_s14 = int_to_ptr.hbm [resolvable:$true] %s172_s14 }
   0xc   :  { %vm142_vm6 = vmor %vm263_vm7, %vm259_vm1  ;;  %v60_v14 = vpack.c.bf16 %v30_v7, %v29_v6  ;;  %v35_v16 = vperm.slane %v24_v8, 0  ;;  %v36_v17 = vperm.slane %v24_v8, 1  ;;  %v61_v18 = vpack.c.bf16 %v32_v10, %v31_v9 }
   0xd   :  { %vm145_vm9 = vmand %vm339_vm8, %vm144_vm4  ;;  %v62_v19 = vpack.c.bf16 %v34_v12, %v33_v11  ;;  %v37_v21 = vperm.slane %v24_v8, 2  ;;  %v38_v22 = vperm.slane %v24_v8, 3  ;;  %v75_v23 = vrot.slane %v59_v13, 3 }
   0xe   :  { %vm273_vm10 = vmor %vm145_vm9, %vm142_vm6  ;;  %v76_v24 = vrot.slane %v60_v14, 6  ;;  %v77_v25 = vrot.slane %v60_v14, 1  ;;  %v39_v26 = vperm.slane %v24_v8, 4  ;;  %v78_v27 = vrot.slane %v61_v18, 4 }
   0xf   :  { %vm279_vm15 = vmand %vm147_vm5, %vm148_vm3  ;;  %v79_v28 = vrot.slane %v61_v18, 7  ;;  %v80_v29 = vrot.slane %v62_v19, 2  ;;  %v81_v30 = vrot.slane %v62_v19, 5  ;;  %vm344_vm4 = vcmask 1046534  }
  0x10   :  { %vm150_vm1 = vmor %vm279_vm15, %vm273_vm10  ;;  %vm345_vm3 = vcmask 1040384   ;;  %v96_v32 = vsel %vm93_vm2, %v76_v24, %v77_v25  ;;  %v40_v34 = vperm.slane %v24_v8, 5  ;;  %v41_v35 = vperm.slane %v24_v8, 6 }
  0x11   :  { %vm153_vm5 = vmand %vm344_vm4, %vm152_vm11  ;;  %v92_v31 = vsel %vm345_vm3, %v59_v13, %v75_v23  ;;  %vm348_vm6 = vcmask 1041408   ;;  %v102_v37 = vsel %vm339_vm8, %v78_v27, %v79_v28  ;;  %v42_v41 = vperm.slane %v24_v8, 7 }
  0x12   :  { %vm291_vm7 = vmor %vm153_vm5, %vm150_vm1  ;;  %v98_v36 = vsel %vm348_vm6, %v92_v31, %v96_v32  ;;  %v63_v43 = vpack.c.bf16 %v36_v17, %v35_v16  ;;  %v64_v44 = vpack.c.bf16 %v38_v22, %v37_v21  ;;  %v65_v45 = vpack.c.bf16 %v40_v34, %v39_v26 }
  0x13   :  { %vm349_vm9 = vmmov %vm344_vm4  ;;  %v66_v47 = vpack.c.bf16 %v42_v41, %v41_v35 }
  0x14   :  { %v106_v38 = vsel %vm349_vm9, %v80_v29, %v81_v30  ;;  %vm300_vm10 = vmand %vm155_vm12, %vm156_vm13  ;;  %v82_v49 = vrot.slane %v63_v43, 3  ;;  %v83_v50 = vrot.slane %v64_v44, 6  ;;  %v84_v51 = vrot.slane %v64_v44, 1 }
  0x15   :  { %v108_v42 = vsel %vm107_vm14, %v102_v37, %v106_v38  ;;  %vm158_vm11 = vmor %vm300_vm10, %vm291_vm7  ;;  %v85_v52 = vrot.slane %v65_v45, 4  ;;  %v86_v53 = vrot.slane %v65_v45, 7  ;;  %v87_v54 = vrot.slane %v66_v47, 2 }
  0x16   :  { %v110_v46 = vsel %vm109_vm0, %v98_v36, %v108_v42  ;;  %v88_v55 = vrot.slane %v66_v47, 5  ;;  %vm352_vm12 = vmmov %vm345_vm3  ;;  %v116_v57 = vsel %vm93_vm2, %v83_v50, %v84_v51 }
  0x17   :  { %v160_v48 = vsel %vm158_vm11, %v110_v46, %v159_v40  ;;  %v113_v56 = vsel %vm352_vm12, %v63_v43, %v82_v49  ;;  %vm353_vm13 = vmmov %vm348_vm6 }
  0x18   :  { %161 = vst [vmem:[#allocation5] sm:$0xff] %v160_v48  ;;  %v117_v58 = vsel %vm353_vm13, %v113_v56, %v116_v57  ;;  %vm354_vm15 = vmmov %vm339_vm8 }
  0x19   :  { %v120_v59 = vsel %vm354_vm15, %v85_v52, %v86_v53  ;;  %vm355_vm1 = vmmov %vm344_vm4 }
  0x1a   :  { %v123_v60 = vsel %vm355_vm1, %v87_v54, %v88_v55 }
  0x1b   :  { %v124_v62 = vsel %vm107_vm14, %v120_v59, %v123_v60 }
  0x1c   :  { %v125_v63 = vsel %vm109_vm0, %v117_v58, %v124_v62 }
  0x1d   :  { %v163_v0 = vsel %vm158_vm11, %v125_v63, %v162_v61 }
  0x1e   :  { %164 = vst [vmem:[#allocation5 + $0x8] sm:$0xff] %v163_v0 }
  0x1f   :  { %175 = dma.vmem_to_hbm [thread:$0]  %s171_s11, 256, %s173_s14, [#allocation4]  }
  0x20   :  { %234 = dma.done.wait [#allocation4], 256  }
  0x21   :  { %235 = vsyncadd [#allocation4], 4294967040 }
  0x22   :  { %180 = vsyncpa [#allocation3], 1 }
  0x23   :  { %181 = vsyncpa [#allocation4], 1 }

</bundles_post_ra>
